<compile_context>
chip_gen: v7x
topology: tpu7x:2x2x1
jax: 0.10.0
libtpu: 0.0.40
codegen_flags: <defaults>
</compile_context>

<pallas_src>
import math

import jax
import jax.numpy as jnp
from jax.experimental import pallas as pl
from jax.experimental.pallas import tpu as pltpu


def _round_up(x, m):
    return ((x + m - 1) // m) * m


def _box_predictor_kernel(x_ref, w6_ref, b6_ref, w7_ref, b7_ref,
                          wh_ref, bh_ref, out_ref, acc_ref):
    """Grid axes: (ROI tile i ["parallel"], fc6 reduction tile k ["arbitrary"])."""
    k = pl.program_id(1)

    @pl.when(k == 0)
    def _init():
        acc_ref[...] = jnp.zeros_like(acc_ref)

    # fc6 partial product: bf16 operands, f32 accumulation on the MXU.
    acc_ref[...] += jnp.dot(x_ref[...], w6_ref[...],
                            preferred_element_type=jnp.float32)

    @pl.when(k == pl.num_programs(1) - 1)
    def _finalize():
        # fc6 bias + ReLU (kept in f32: v5e VPU/EUP have no bf16 elementwise).
        h = jnp.maximum(acc_ref[...] + b6_ref[...], 0.0)
        # fc7 + ReLU (resident weight, single MXU op per ROI tile).
        h = jnp.dot(h.astype(jnp.bfloat16), w7_ref[...],
                    preferred_element_type=jnp.float32) + b7_ref[...]
        h = jnp.maximum(h, 0.0)
        # Fused cls_score | bbox_pred head: one wide MXU op, one lane-dense
        # (128-multiple) store instead of two masked narrow stores.
        out = jnp.dot(h.astype(jnp.bfloat16), wh_ref[...],
                      preferred_element_type=jnp.float32) + bh_ref[...]
        out_ref[...] = out.astype(out_ref.dtype)


def maskrcnn_box_predictor(box_features, params, *,
                           tile_n_target=512, tile_k_target=1024):
    """box_features: [N, C, H, W] float32.  Returns (class_logits, box_regression)."""
    N = box_features.shape[0]
    D = math.prod(box_features.shape[1:])
    rep = params["w6"].shape[1]
    num_classes = params["wcls"].shape[1]
    out_cols = 5 * num_classes
    out_pad = _round_up(out_cols, 128)

    # torch.flatten(x, 1); contiguous NCHW reshape is metadata-only in XLA.
    x = box_features.reshape(N, D).astype(jnp.bfloat16)

    # ---- tile sizing (works for toy shapes and production 1000x12544) ----
    tile_n = min(tile_n_target, _round_up(N, 8))
    n_pad = _round_up(N, tile_n)
    d_pad = _round_up(D, 128)
    tile_k = min(tile_k_target, d_pad)
    d_pad = _round_up(d_pad, tile_k)

    # Zero-pad activations / fc6 weight so the grid divides evenly (zeros
    # contribute nothing to the accumulation; padded rows are sliced off).
    x = jnp.pad(x, ((0, n_pad - N), (0, d_pad - D)))
    w6 = jnp.pad(params["w6"].astype(jnp.bfloat16), ((0, d_pad - D), (0, 0)))
    b6 = params["b6"].astype(jnp.float32)
    w7 = params["w7"].astype(jnp.bfloat16)
    b7 = params["b7"].astype(jnp.float32)
    # Fused heads: [rep, 5*num_classes] -> padded to a multiple of 128 lanes.
    wh = jnp.pad(
        jnp.concatenate([params["wcls"], params["wbox"]], axis=1).astype(jnp.bfloat16),
        ((0, 0), (0, out_pad - out_cols)))
    bh = jnp.pad(
        jnp.concatenate([params["bcls"], params["bbox"]], axis=1).astype(jnp.float32),
        ((0, 0), (0, out_pad - out_cols)))

    grid = (n_pad // tile_n, d_pad // tile_k)

    # VMEM budget: streamed x + w6 slabs (double-buffered), resident fc7/head
    # weights & biases, double-buffered output tile, f32 accumulator scratch.
    vmem_est = (
        2 * tile_n * tile_k * 2
        + 2 * tile_k * rep * 2
        + rep * rep * 2
        + rep * out_pad * 2
        + (2 * rep + out_pad) * 4
        + 2 * tile_n * out_pad * 4
        + tile_n * rep * 4
    )
    # Cap with headroom so one config also fits v7x's 64 MiB physical VMEM.
    vmem_limit = max(16 << 20, min(int(1.5 * vmem_est) + (2 << 20), 48 << 20))

    flops = 2 * n_pad * (d_pad * rep + rep * rep + rep * out_pad)
    bytes_accessed = (
        x.size * 2 + (n_pad // tile_n) * w6.size * 2 + w7.size * 2 + wh.size * 2
        + (b6.size + b7.size + bh.size) * 4
        + n_pad * out_pad * 4
    )

    grid_spec = pltpu.PrefetchScalarGridSpec(
        num_scalar_prefetch=0,
        grid=grid,
        in_specs=[
            pl.BlockSpec((tile_n, tile_k), lambda i, k: (i, k)),   # x tiles stream
            pl.BlockSpec((tile_k, rep),    lambda i, k: (k, 0)),   # w6 K-slabs stream
            pl.BlockSpec((1, rep),         lambda i, k: (0, 0)),   # b6 resident
            pl.BlockSpec((rep, rep),       lambda i, k: (0, 0)),   # w7 resident
            pl.BlockSpec((1, rep),         lambda i, k: (0, 0)),   # b7 resident
            pl.BlockSpec((rep, out_pad),   lambda i, k: (0, 0)),   # fused head W resident
            pl.BlockSpec((1, out_pad),     lambda i, k: (0, 0)),   # fused head b resident
        ],
        out_specs=pl.BlockSpec((tile_n, out_pad), lambda i, k: (i, 0)),
        scratch_shapes=[pltpu.VMEM((tile_n, rep), jnp.float32)],
    )

    fused_out = pl.pallas_call(
        _box_predictor_kernel,
        out_shape=jax.ShapeDtypeStruct((n_pad, out_pad), jnp.float32),
        grid_spec=grid_spec,
        compiler_params=pltpu.CompilerParams(
            dimension_semantics=("parallel", "arbitrary"),
            vmem_limit_bytes=vmem_limit),
        cost_estimate=pl.CostEstimate(flops=flops, transcendentals=0,
                                      bytes_accessed=bytes_accessed),
    )(x, w6, b6, w7, b7, wh, bh)

    # Split / unpad the fused lane-dense output back into the two module outputs.
    class_logits = fused_out[:N, :num_classes]
    box_regression = fused_out[:N, num_classes:out_cols]
    return class_logits, box_regression


def init_params(key, in_dim, rep_dim, num_classes):
    """Deterministic synthetic weights.  Weights stored as [in, out] (= torch W.T),
    biases as [1, out] for clean 2-D broadcasting on TPU."""
    ks = jax.random.split(key, 8)

    def w(k, i, o):
        return jax.random.normal(k, (i, o), jnp.float32) * (1.0 / jnp.sqrt(i))

    return {
        "w6":   w(ks[0], in_dim, rep_dim),
        "b6":   jax.random.normal(ks[1], (1, rep_dim), jnp.float32) * 0.01,
        "w7":   w(ks[2], rep_dim, rep_dim),
        "b7":   jax.random.normal(ks[3], (1, rep_dim), jnp.float32) * 0.01,
        "wcls": w(ks[4], rep_dim, num_classes),
        "bcls": jax.random.normal(ks[5], (1, num_classes), jnp.float32) * 0.01,
        "wbox": w(ks[6], rep_dim, num_classes * 4),
        "bbox": jax.random.normal(ks[7], (1, num_classes * 4), jnp.float32) * 0.01,
    }


def _reference(box_features, params):
    """Pure-JAX reference with the same bf16-operand / f32-accumulate numerics."""
    N = box_features.shape[0]
    x = box_features.reshape(N, -1).astype(jnp.bfloat16)
    w6 = params["w6"].astype(jnp.bfloat16)
    w7 = params["w7"].astype(jnp.bfloat16)
    wc = params["wcls"].astype(jnp.bfloat16)
    wb = params["wbox"].astype(jnp.bfloat16)
    h = jnp.maximum(jnp.dot(x, w6, preferred_element_type=jnp.float32)
                    + params["b6"], 0.0)
    h = jnp.maximum(jnp.dot(h.astype(jnp.bfloat16), w7,
                            preferred_element_type=jnp.float32) + params["b7"], 0.0)
    hb = h.astype(jnp.bfloat16)
    cls = jnp.dot(hb, wc, preferred_element_type=jnp.float32) + params["bcls"]
    box = jnp.dot(hb, wb, preferred_element_type=jnp.float32) + params["bbox"]
    return cls, box


if __name__ == "__main__":
    key = jax.random.PRNGKey(0)
    k_x, k_p = jax.random.split(key)

    # Small synthetic shapes consistent with pooled ROI features:
    # N rois=8, channels=4, spatial=4x4 -> flattened dim 64
    N, C, H, W = 8, 4, 4, 4
    REP = 128           # representation_size of TwoMLPHead (scaled down)
    NUM_CLASSES = 8

    box_features = jax.random.normal(k_x, (N, C, H, W), jnp.float32)
    params = init_params(k_p, C * H * W, REP, NUM_CLASSES)

    class_logits, box_regression = maskrcnn_box_predictor(box_features, params)
    jax.block_until_ready((class_logits, box_regression))

    ref_cls, ref_box = _reference(box_features, params)
    assert class_logits.shape == (N, NUM_CLASSES)
    assert box_regression.shape == (N, NUM_CLASSES * 4)
    assert jnp.allclose(class_logits, ref_cls, atol=2e-3, rtol=2e-3)
    assert jnp.allclose(box_regression, ref_box, atol=2e-3, rtol=2e-3)

    print("KERNEL_OK")
</pallas_src>

<mosaic_0001>
module attributes {stable_mosaic.version = 11 : i64} {
  func.func @_box_predictor_kernel(%arg0: i32, %arg1: i32, %arg2: memref<8x128xbf16, #tpu.memory_space<vmem>>, %arg3: memref<128x128xbf16, #tpu.memory_space<vmem>>, %arg4: memref<1x128xf32, #tpu.memory_space<vmem>>, %arg5: memref<128x128xbf16, #tpu.memory_space<vmem>>, %arg6: memref<1x128xf32, #tpu.memory_space<vmem>>, %arg7: memref<128x128xbf16, #tpu.memory_space<vmem>>, %arg8: memref<1x128xf32, #tpu.memory_space<vmem>>, %arg9: memref<8x128xf32, #tpu.memory_space<vmem>>, %arg10: memref<8x128xf32, #tpu.memory_space<vmem>>) attributes {dimension_semantics = [#tpu.dimension_semantics<parallel>, #tpu.dimension_semantics<arbitrary>], iteration_bounds = array<i64: 1, 1>, scalar_prefetch = 0 : i64, scratch_operands = 1 : i64, tpu.core_type = #tpu.core_type<tc>, window_params = [{transform_indices = @transform_0, window_bounds = array<i64: 8, 128>}, {transform_indices = @transform_1, window_bounds = array<i64: 128, 128>}, {pipeline_mode = #tpu.pipeline_mode<synchronous>, transform_indices = @transform_2, window_bounds = array<i64: 1, 128>}, {pipeline_mode = #tpu.pipeline_mode<synchronous>, transform_indices = @transform_3, window_bounds = array<i64: 128, 128>}, {pipeline_mode = #tpu.pipeline_mode<synchronous>, transform_indices = @transform_4, window_bounds = array<i64: 1, 128>}, {pipeline_mode = #tpu.pipeline_mode<synchronous>, transform_indices = @transform_5, window_bounds = array<i64: 128, 128>}, {pipeline_mode = #tpu.pipeline_mode<synchronous>, transform_indices = @transform_6, window_bounds = array<i64: 1, 128>}, {transform_indices = @transform_7, window_bounds = array<i64: 8, 128>}]} {
    %c0_i32 = arith.constant 0 : i32
    %0 = arith.cmpi eq, %arg1, %c0_i32 : i32
    %1 = arith.extui %0 : i1 to i32
    %c0_i32_0 = arith.constant 0 : i32
    %2 = arith.cmpi ne, %1, %c0_i32_0 : i32
    scf.if %2 {
      %cst_10 = arith.constant 0.000000e+00 : f32
      %12 = vector.broadcast %cst_10 : f32 to vector<8x128xf32>
      %c0_11 = arith.constant 0 : index
      %c0_12 = arith.constant 0 : index
      %13 = vector.load %arg10[%c0_11, %c0_12] : memref<8x128xf32, #tpu.memory_space<vmem>>, vector<8x128xf32>
      tpu.vector_store %arg10[%c0_11, %c0_12], %12 {strides = array<i32>} : memref<8x128xf32, #tpu.memory_space<vmem>>, vector<8x128xf32>,
    } else {
    }
    %c0 = arith.constant 0 : index
    %c0_1 = arith.constant 0 : index
    %3 = vector.load %arg10[%c0, %c0_1] : memref<8x128xf32, #tpu.memory_space<vmem>>, vector<8x128xf32>
    %c0_2 = arith.constant 0 : index
    %c0_3 = arith.constant 0 : index
    %4 = vector.load %arg2[%c0_2, %c0_3] : memref<8x128xbf16, #tpu.memory_space<vmem>>, vector<8x128xbf16>
    %c0_4 = arith.constant 0 : index
    %c0_5 = arith.constant 0 : index
    %5 = vector.load %arg3[%c0_4, %c0_5] : memref<128x128xbf16, #tpu.memory_space<vmem>>, vector<128x128xbf16>
    %cst = arith.constant dense<0.000000e+00> : vector<8x128xf32>
    %6 = tpu.matmul %4, %5, %cst {dimension_numbers = #tpu.dot_dimension_numbers<[1], [0], [0], [1], [0, 0, 1, 1], [], []>} : vector<8x128xbf16>, vector<128x128xbf16>, vector<8x128xf32> -> vector<8x128xf32>
    %7 = arith.addf %3, %6 : vector<8x128xf32>
    %c0_6 = arith.constant 0 : index
    %c0_7 = arith.constant 0 : index
    %8 = vector.load %arg10[%c0_6, %c0_7] : memref<8x128xf32, #tpu.memory_space<vmem>>, vector<8x128xf32>
    tpu.vector_store %arg10[%c0_6, %c0_7], %7 {strides = array<i32>} : memref<8x128xf32, #tpu.memory_space<vmem>>, vector<8x128xf32>,
    %c0_i32_8 = arith.constant 0 : i32
    %9 = arith.cmpi eq, %arg1, %c0_i32_8 : i32
    %10 = arith.extui %9 : i1 to i32
    %c0_i32_9 = arith.constant 0 : i32
    %11 = arith.cmpi ne, %10, %c0_i32_9 : i32
    scf.if %11 {
      %c0_10 = arith.constant 0 : index
      %c0_11 = arith.constant 0 : index
      %12 = vector.load %arg10[%c0_10, %c0_11] : memref<8x128xf32, #tpu.memory_space<vmem>>, vector<8x128xf32>
      %c0_12 = arith.constant 0 : index
      %c0_13 = arith.constant 0 : index
      %13 = vector.load %arg4[%c0_12, %c0_13] : memref<1x128xf32, #tpu.memory_space<vmem>>, vector<1x128xf32>
      %14 = vector.broadcast %13 : vector<1x128xf32> to vector<8x128xf32>
      %15 = arith.addf %12, %14 : vector<8x128xf32>
      %cst_14 = arith.constant 0.000000e+00 : f32
      %16 = vector.broadcast %cst_14 : f32 to vector<8x128xf32>
      %17 = arith.maximumf %15, %16 : vector<8x128xf32>
      %18 = arith.truncf %17 : vector<8x128xf32> to vector<8x128xbf16>
      %c0_15 = arith.constant 0 : index
      %c0_16 = arith.constant 0 : index
      %19 = vector.load %arg5[%c0_15, %c0_16] : memref<128x128xbf16, #tpu.memory_space<vmem>>, vector<128x128xbf16>
      %cst_17 = arith.constant dense<0.000000e+00> : vector<8x128xf32>
      %20 = tpu.matmul %18, %19, %cst_17 {dimension_numbers = #tpu.dot_dimension_numbers<[1], [0], [0], [1], [0, 0, 1, 1], [], []>} : vector<8x128xbf16>, vector<128x128xbf16>, vector<8x128xf32> -> vector<8x128xf32>
      %c0_18 = arith.constant 0 : index
      %c0_19 = arith.constant 0 : index
      %21 = vector.load %arg6[%c0_18, %c0_19] : memref<1x128xf32, #tpu.memory_space<vmem>>, vector<1x128xf32>
      %22 = vector.broadcast %21 : vector<1x128xf32> to vector<8x128xf32>
      %23 = arith.addf %20, %22 : vector<8x128xf32>
      %cst_20 = arith.constant 0.000000e+00 : f32
      %24 = vector.broadcast %cst_20 : f32 to vector<8x128xf32>
      %25 = arith.maximumf %23, %24 : vector<8x128xf32>
      %26 = arith.truncf %25 : vector<8x128xf32> to vector<8x128xbf16>
      %c0_21 = arith.constant 0 : index
      %c0_22 = arith.constant 0 : index
      %27 = vector.load %arg7[%c0_21, %c0_22] : memref<128x128xbf16, #tpu.memory_space<vmem>>, vector<128x128xbf16>
      %cst_23 = arith.constant dense<0.000000e+00> : vector<8x128xf32>
      %28 = tpu.matmul %26, %27, %cst_23 {dimension_numbers = #tpu.dot_dimension_numbers<[1], [0], [0], [1], [0, 0, 1, 1], [], []>} : vector<8x128xbf16>, vector<128x128xbf16>, vector<8x128xf32> -> vector<8x128xf32>
      %c0_24 = arith.constant 0 : index
      %c0_25 = arith.constant 0 : index
      %29 = vector.load %arg8[%c0_24, %c0_25] : memref<1x128xf32, #tpu.memory_space<vmem>>, vector<1x128xf32>
      %30 = vector.broadcast %29 : vector<1x128xf32> to vector<8x128xf32>
      %31 = arith.addf %28, %30 : vector<8x128xf32>
      %c0_26 = arith.constant 0 : index
      %c0_27 = arith.constant 0 : index
      %32 = vector.load %arg9[%c0_26, %c0_27] : memref<8x128xf32, #tpu.memory_space<vmem>>, vector<8x128xf32>
      tpu.vector_store %arg9[%c0_26, %c0_27], %31 {strides = array<i32>} : memref<8x128xf32, #tpu.memory_space<vmem>>, vector<8x128xf32>,
    } else {
    }
    return
  }
  func.func @transform_0(%arg0: i32, %arg1: i32) -> (i32, i32) {
    %c0_i32 = arith.constant 0 : i32
    return %arg0, %arg1 : i32, i32
  }
  func.func @transform_1(%arg0: i32, %arg1: i32) -> (i32, i32) {
    %c0_i32 = arith.constant 0 : i32
    %c0_i32_0 = arith.constant 0 : i32
    return %arg1, %c0_i32 : i32, i32
  }
  func.func @transform_2(%arg0: i32, %arg1: i32) -> (i32, i32) {
    %c0_i32 = arith.constant 0 : i32
    %c0_i32_0 = arith.constant 0 : i32
    %c0_i32_1 = arith.constant 0 : i32
    return %c0_i32, %c0_i32_0 : i32, i32
  }
  func.func @transform_3(%arg0: i32, %arg1: i32) -> (i32, i32) {
    %c0_i32 = arith.constant 0 : i32
    %c0_i32_0 = arith.constant 0 : i32
    %c0_i32_1 = arith.constant 0 : i32
    return %c0_i32, %c0_i32_0 : i32, i32
  }
  func.func @transform_4(%arg0: i32, %arg1: i32) -> (i32, i32) {
    %c0_i32 = arith.constant 0 : i32
    %c0_i32_0 = arith.constant 0 : i32
    %c0_i32_1 = arith.constant 0 : i32
    return %c0_i32, %c0_i32_0 : i32, i32
  }
  func.func @transform_5(%arg0: i32, %arg1: i32) -> (i32, i32) {
    %c0_i32 = arith.constant 0 : i32
    %c0_i32_0 = arith.constant 0 : i32
    %c0_i32_1 = arith.constant 0 : i32
    return %c0_i32, %c0_i32_0 : i32, i32
  }
  func.func @transform_6(%arg0: i32, %arg1: i32) -> (i32, i32) {
    %c0_i32 = arith.constant 0 : i32
    %c0_i32_0 = arith.constant 0 : i32
    %c0_i32_1 = arith.constant 0 : i32
    return %c0_i32, %c0_i32_0 : i32, i32
  }
  func.func @transform_7(%arg0: i32, %arg1: i32) -> (i32, i32) {
    %c0_i32 = arith.constant 0 : i32
    %c0_i32_0 = arith.constant 0 : i32
    return %arg0, %c0_i32 : i32, i32
  }
}

</mosaic_0001>

<bundles_post_ra>
// kernel: tpu_custom_call.1
= control target key start
LH: loop header
LB: loop body
LE: loop exit
PB: predicated region body
PF: predicated region fallthrough
CT: control target
= control target key end

     0   :  { %12 = vsyncpa [#allocation4], 0  ;;  %s872_s0 = inlined_call_operand.hbm [shape: bf16[8,128], index: 0, kind: input, shape index: {}]   ;;  %s873_s1 = inlined_call_operand.hbm [shape: bf16[128,128], index: 1, kind: input, shape index: {}]   ;;  %s874_s2 = inlined_call_operand.vmem [shape: f32[1,128], index: 2, kind: input, shape index: {}]   ;;  %s875_s3 = inlined_call_operand.hbm [shape: bf16[128,128], index: 3, kind: input, shape index: {}]   ;;  %s876_s4 = inlined_call_operand.vmem [shape: f32[1,128], index: 4, kind: input, shape index: {}]   ;;  %s877_s5 = inlined_call_operand.hbm [shape: bf16[128,128], index: 5, kind: input, shape index: {}]   ;;  %s878_s6 = inlined_call_operand.vmem [shape: f32[1,128], index: 6, kind: input, shape index: {}]   ;;  %s879_s7 = inlined_call_operand.hbm [shape: f32[8,128], index: 7, kind: output, shape index: {}]  }
   0x1   :  { %13 = vsyncpa [#allocation7], 0 }
   0x2   :  { %14 = vsyncpa [#allocation10], 0 }
   0x3   :  { %15 = vsyncpa [#allocation5], 0  ;;  %s715_s24 = smov [#allocation6]   ;;  %s597_s28 = scalar_lea.hbm %s873_s1, 1024 }
   0x4   :  { %s31_s25 = sshll.u32 %s715_s24, 4  ;;  %p598_p0 = scmp.ne.s32.totalorder %s873_s1, %s597_s28  ;;  %s32_s25 = int_to_ptr.vmem [resolvable:$true] %s31_s25 }
   0x5   :  { %p601_p1 = scmp.lt.u32.totalorder %s597_s28, %s873_s1 }
   0x7   :  { %p603_p2 = pnand %p601_p1, %p598_p0 }
   0x9   :  { %606 = shalt.err (!%p603_p2)
}
   0xa   :  { %s607_s10 = scalar_lea.vmem %s32_s25, 1024  ;;  %p612_p4 = scmp.lt.s32.totalorder %s32_s25, %s32_s25 }
   0xb   :  { %p608_p3 = scmp.ne.s32.totalorder %s32_s25, %s607_s10  ;;  %p613_p5 = scmp.lt.s32.totalorder %s607_s10, %s607_s10 }
   0xd   :  { %p614_p6 = por %p613_p5, %p612_p4 }
   0xf   :  { %p615_p7 = pnand %p614_p6, %p608_p3 }
  0x11   :  { %618 = shalt.err (!%p615_p7)
}
  0x12   :  { %s716_s11 = smov 64   ;;  %s717_s12 = smov 4  }
  0x13   :  { %37 = dma.hbm_to_vmem [thread:$0]  %s873_s1, 1024, %s32_s25, [#allocation7], %s716_s11, %s716_s11, %s717_s12  }
  0x14   :  { %s718_s15 = smov [#allocation3]   ;;  %s719_s17 = smov [#allocation8]  }
  0x15   :  { %s22_s16 = sshll.u32 %s718_s15, 4  ;;  %s45_s18 = sshll.u32 %s719_s17, 4  ;;  %s23_s16 = int_to_ptr.vmem [resolvable:$true] %s22_s16  ;;  %s46_s18 = int_to_ptr.vmem [resolvable:$true] %s45_s18 }
  0x16   :  { %s619_s21 = scalar_lea.hbm %s872_s0, 64 }
  0x17   :  { %p620_p8 = scmp.ne.s32.totalorder %s872_s0, %s619_s21  ;;  %p623_p9 = scmp.lt.u32.totalorder %s619_s21, %s872_s0 }
  0x19   :  { %p625_p10 = pnand %p623_p9, %p620_p8 }
  0x1b   :  { %628 = shalt.err (!%p625_p10)
}
  0x1c   :  { %s629_s1 = scalar_lea.vmem %s23_s16, 64  ;;  %p634_p12 = scmp.lt.s32.totalorder %s23_s16, %s23_s16 }
  0x1d   :  { %p630_p11 = scmp.ne.s32.totalorder %s23_s16, %s629_s1  ;;  %p635_p13 = scmp.lt.s32.totalorder %s629_s1, %s629_s1 }
  0x1f   :  { %p636_p0 = por %p635_p13, %p634_p12 }
  0x21   :  { %p637_p1 = pnand %p636_p0, %p630_p11 }
  0x23   :  { %640 = shalt.err (!%p637_p1)
}
  0x24   :  { %25 = dma.hbm_to_vmem [thread:$0]  %s872_s0, 64, %s23_s16, [#allocation4]  }
  0x25   :  { %s641_s30 = scalar_lea.hbm %s875_s3, 1024 }
  0x26   :  { %p642_p2 = scmp.ne.s32.totalorder %s875_s3, %s641_s30  ;;  %p645_p3 = scmp.lt.u32.totalorder %s641_s30, %s875_s3 }
  0x28   :  { %p647_p4 = pnand %p645_p3, %p642_p2 }
  0x2a   :  { %650 = shalt.err (!%p647_p4)
}
  0x2b   :  { %s651_s14 = scalar_lea.vmem %s46_s18, 1024  ;;  %p656_p6 = scmp.lt.s32.totalorder %s46_s18, %s46_s18 }
  0x2c   :  { %p652_p5 = scmp.ne.s32.totalorder %s46_s18, %s651_s14  ;;  %p657_p7 = scmp.lt.s32.totalorder %s651_s14, %s651_s14 }
  0x2e   :  { %p658_p8 = por %p657_p7, %p656_p6 }
  0x30   :  { %p659_p9 = pnand %p658_p8, %p652_p5 }
  0x32   :  { %662 = shalt.err (!%p659_p9)
}
  0x33   :  { %51 = dma.hbm_to_vmem [thread:$0]  %s875_s3, 1024, %s46_s18, [#allocation7], %s716_s11, %s716_s11, %s717_s12  }
  0x34   :  { %s720_s16 = smov [#allocation9]   ;;  %s663_s21 = scalar_lea.hbm %s877_s5, 1024 }
  0x35   :  { %s59_s17 = sshll.u32 %s720_s16, 4  ;;  %p664_p10 = scmp.ne.s32.totalorder %s877_s5, %s663_s21  ;;  %s60_s17 = int_to_ptr.vmem [resolvable:$true] %s59_s17 }
  0x36   :  { %p667_p11 = scmp.lt.u32.totalorder %s663_s21, %s877_s5 }
  0x38   :  { %p669_p12 = pnand %p667_p11, %p664_p10 }
  0x3a   :  { %672 = shalt.err (!%p669_p12)
}
  0x3b   :  { %s673_s1 = scalar_lea.vmem %s60_s17, 1024  ;;  %p678_p0 = scmp.lt.s32.totalorder %s60_s17, %s60_s17 }
  0x3c   :  { %p674_p13 = scmp.ne.s32.totalorder %s60_s17, %s673_s1  ;;  %p679_p1 = scmp.lt.s32.totalorder %s673_s1, %s673_s1 }
  0x3e   :  { %p680_p2 = por %p679_p1, %p678_p0 }
  0x40   :  { %p681_p3 = pnand %p680_p2, %p674_p13 }
  0x42   :  { %684 = shalt.err (!%p681_p3)
}
  0x43   :  { %65 = dma.hbm_to_vmem [thread:$0]  %s877_s5, 1024, %s60_s17, [#allocation10], %s716_s11, %s716_s11, %s717_s12  }
  0x44   :  { %707 = dma.done.wait [#allocation4], 64  }
  0x45   :  { %708 = vsyncadd [#allocation4], 4294967232 }
  0x46   :  { %709 = dma.done.wait [#allocation7], 2048  }
  0x47   :  { %710 = vsyncadd [#allocation7], 4294965248 }
  0x48   :  { %711 = dma.done.wait [#allocation10], 1024  }
  0x49   :  { %712 = vsyncadd [#allocation10], 4294966272  ;;  %v721_v0 = vmov 0.0   ;;  %vm722_vm0 = vmmov 0   ;;  %v573_v1 = vld [vmem:[#allocation6] sm:$0xff]   ;;  %v574_v2 = vld [vmem:[#allocation6 + $0x8] sm:$0xff]  }
  0x4a   :  { %504 = vmatprep.subr.bf16.mxu0 %v721_v0  ;;  %520 = vmatprep.mubr.msk.bf16.mxu0 %vm722_vm0, %v721_v0  ;;  %v575_v3 = vld [vmem:[#allocation6 + $0x10] sm:$0xff]   ;;  %v581_v4 = vld [vmem:[#allocation8] sm:$0xff]   ;;  %v576_v5 = vld [vmem:[#allocation6 + $0x18] sm:$0xff]   ;;  %s723_s28 = smov [#allocation11]  }
  0x4b   :  { %524 = vmatprep.subr.bf16.mxu1 %v721_v0  ;;  %540 = vmatprep.mubr.msk.bf16.mxu1 %vm722_vm0, %v721_v0  ;;  %v582_v6 = vld [vmem:[#allocation8 + $0x8] sm:$0xff]   ;;  %v577_v7 = vld [vmem:[#allocation6 + $0x20] sm:$0xff]   ;;  %v583_v8 = vld [vmem:[#allocation8 + $0x10] sm:$0xff]   ;;  %s439_s29 = sshll.u32 %s723_s28, 4  ;;  %s440_s29 = int_to_ptr.vmem [resolvable:$true] %s439_s29 }
  0x4c   :  { %505 = vmatpush3.bf16.msra.mxu0 %v573_v1  ;;  %525 = vmatpush3.bf16.msra.mxu1 %v581_v4  ;;  %v578_v9 = vld [vmem:[#allocation6 + $0x28] sm:$0xff]   ;;  %v584_v10 = vld [vmem:[#allocation8 + $0x18] sm:$0xff]   ;;  %v579_v11 = vld [vmem:[#allocation6 + $0x30] sm:$0xff]   ;;  %p690_p5 = scmp.lt.s32.totalorder %s440_s29, %s440_s29 }
  0x4d   :  { %506 = vmatprep.subr.bf16.mxu0 %v721_v0  ;;  %526 = vmatprep.subr.bf16.mxu1 %v721_v0  ;;  %v585_v12 = vld [vmem:[#allocation8 + $0x20] sm:$0xff]   ;;  %v580_v13 = vld [vmem:[#allocation6 + $0x38] sm:$0xff]   ;;  %v586_v14 = vld [vmem:[#allocation8 + $0x28] sm:$0xff]  }
  0x4e   :  { %v87_v15 = vld [vmem:[#allocation3] sm:$0xf]  ;;  %v587_v16 = vld [vmem:[#allocation8 + $0x30] sm:$0xff]   ;;  %v589_v18 = vld [vmem:[#allocation9] sm:$0xff]  }
  0x4f   :  { %v588_v17 = vld [vmem:[#allocation8 + $0x38] sm:$0xff]   ;;  %v590_v19 = vld [vmem:[#allocation9 + $0x8] sm:$0xff]   ;;  %v591_v20 = vld [vmem:[#allocation9 + $0x10] sm:$0xff]  }
  0x50   :  { %507 = vmatpush3.bf16.msra.mxu0 %v574_v2  ;;  %527 = vmatpush3.bf16.msra.mxu1 %v582_v6  ;;  %v592_v21 = vld [vmem:[#allocation9 + $0x18] sm:$0xff]   ;;  %v593_v22 = vld [vmem:[#allocation9 + $0x20] sm:$0xff]   ;;  %v594_v23 = vld [vmem:[#allocation9 + $0x28] sm:$0xff]  }
  0x51   :  { %508 = vmatprep.subr.bf16.mxu0 %v721_v0  ;;  %528 = vmatprep.subr.bf16.mxu1 %v721_v0  ;;  %v458_v24 = vld [vmem:[%s874_s2] ss:$0 sm:$0xff]  ;;  %v595_v32 = vld [vmem:[#allocation9 + $0x30] sm:$0xff]  }
  0x52   :  { %v596_v33 = vld [vmem:[#allocation9 + $0x38] sm:$0xff]  }
  0x53   :  { %v459_v34 = vld [vmem:[%s876_s4] ss:$0 sm:$0xff]  ;;  %s685_s4 = scalar_lea.vmem %s440_s29, 128 }
  0x54   :  { %509 = vmatpush3.bf16.msra.mxu0 %v575_v3  ;;  %529 = vmatpush3.bf16.msra.mxu1 %v583_v8  ;;  %v468_v42 = vld [vmem:[%s878_s6] ss:$0 sm:$0xff]  ;;  %p686_p4 = scmp.ne.s32.totalorder %s440_s29, %s685_s4  ;;  %p691_p6 = scmp.lt.s32.totalorder %s685_s4, %s685_s4 }
  0x55   :  { %510 = vmatprep.subr.bf16.mxu0 %v721_v0  ;;  %530 = vmatprep.subr.bf16.mxu1 %v721_v0 }
  0x56   :  { %p692_p7 = por %p691_p6, %p690_p5 }
  0x58   :  { %511 = vmatpush3.bf16.msra.mxu0 %v576_v5  ;;  %531 = vmatpush3.bf16.msra.mxu1 %v584_v10  ;;  %p693_p8 = pnand %p692_p7, %p686_p4 }
  0x59   :  { %512 = vmatprep.subr.bf16.mxu0 %v721_v0  ;;  %532 = vmatprep.subr.bf16.mxu1 %v721_v0 }
  0x5c   :  { %513 = vmatpush3.bf16.msra.mxu0 %v577_v7  ;;  %533 = vmatpush3.bf16.msra.mxu1 %v585_v12 }
  0x5d   :  { %514 = vmatprep.subr.bf16.mxu0 %v721_v0  ;;  %534 = vmatprep.subr.bf16.mxu1 %v721_v0 }
  0x60   :  { %515 = vmatpush3.bf16.msra.mxu0 %v578_v9  ;;  %535 = vmatpush3.bf16.msra.mxu1 %v586_v14 }
  0x61   :  { %516 = vmatprep.subr.bf16.mxu0 %v721_v0  ;;  %536 = vmatprep.subr.bf16.mxu1 %v721_v0 }
  0x64   :  { %517 = vmatpush3.bf16.msra.mxu0 %v579_v11  ;;  %537 = vmatpush3.bf16.msra.mxu1 %v587_v16 }
  0x65   :  { %518 = vmatprep.subr.bf16.mxu0 %v721_v0  ;;  %538 = vmatprep.subr.bf16.mxu1 %v721_v0 }
  0x68   :  { %519 = vmatpush3.bf16.msra.mxu0 %v580_v13  ;;  %539 = vmatpush3.bf16.msra.mxu1 %v588_v17 }
  0x69   :  { %544 = vmatprep.subr.bf16.mxu0 %v721_v0 }
  0x6b   :  { %521 = vmatmul.mubr.bf16.vlgmr.msra.gmra.mrb[0].mxu0 %v87_v15 }
  0x6c   :  { %560 = vmatprep.mubr.msk.bf16.mxu0 %vm722_vm0, %v721_v0  ;;  %545 = vmatpush3.bf16.msra.mxu0 %v589_v18 }
  0x6d   :  { %546 = vmatprep.subr.bf16.mxu0 %v721_v0 }
  0x70   :  { %547 = vmatpush3.bf16.msra.mxu0 %v590_v19 }
  0x71   :  { %548 = vmatprep.subr.bf16.mxu0 %v721_v0 }
  0x74   :  { %549 = vmatpush3.bf16.msra.mxu0 %v591_v20 }
  0x75   :  { %550 = vmatprep.subr.bf16.mxu0 %v721_v0 }
  0x78   :  { %551 = vmatpush3.bf16.msra.mxu0 %v592_v21 }
  0x79   :  { %552 = vmatprep.subr.bf16.mxu0 %v721_v0 }
  0x7c   :  { %553 = vmatpush3.bf16.msra.mxu0 %v593_v22 }
  0x7d   :  { %554 = vmatprep.subr.bf16.mxu0 %v721_v0 }
  0x80   :  { %555 = vmatpush3.bf16.msra.mxu0 %v594_v23 }
  0x81   :  { %556 = vmatprep.subr.bf16.mxu0 %v721_v0 }
  0x84   :  { %557 = vmatpush3.bf16.msra.mxu0 %v595_v32 }
  0x85   :  { %558 = vmatprep.subr.bf16.mxu0 %v721_v0 }
  0x88   :  { %559 = vmatpush3.bf16.msra.mxu0 %v596_v33 }
 0x13e   :  { %v186_v25 = vpop.f32.mrb[0].mxu0 }
 0x13f   :  { %v205_v26 = vadd.f32 %v458_v24, %v186_v25  ;;  %v522_v27 = vpop.f32.mrb[1].mxu0 }
 0x140   :  { %v189_v28 = vpop.f32.mrb[2].mxu0 }
 0x141   :  { %v206_v29 = vmax.f32 %v205_v26, 0.0  ;;  %v523_v30 = vpop.f32.mrb[3].mxu0 }
 0x143   :  { %v207_v31 = vpack.c.bf16 %v206_v29, %v206_v29 }
 0x145   :  { %541 = vmatmul.mubr.bf16.vlgmr.msra.gmra.mrb[0].mxu1 %v207_v31 }
 0x218   :  { %v313_v35 = vpop.f32.mrb[0].mxu1 }
 0x219   :  { %v314_v36 = vadd.f32 %v459_v34, %v313_v35  ;;  %v542_v37 = vpop.f32.mrb[1].mxu1 }
 0x21a   :  { %v316_v38 = vpop.f32.mrb[2].mxu1 }
 0x21b   :  { %v319_v39 = vmax.f32 %v314_v36, 0.0  ;;  %v543_v40 = vpop.f32.mrb[3].mxu1 }
 0x21d   :  { %v320_v41 = vpack.c.bf16 %v319_v39, %v319_v39 }
 0x21f   :  { %561 = vmatmul.mubr.bf16.vlgmr.msra.gmra.mrb[4].mxu0 %v320_v41 }
 0x2f2   :  { %v426_v43 = vpop.f32.mrb[4].mxu0 }
 0x2f3   :  { %v427_v44 = vadd.f32 %v468_v42, %v426_v43  ;;  %v562_v45 = vpop.f32.mrb[5].mxu0 }
 0x2f4   :  { %v429_v46 = vpop.f32.mrb[6].mxu0 }
 0x2f5   :  { %432 = vst [vmem:[#allocation11] sm:$0xff] %v427_v44  ;;  %v563_v47 = vpop.f32.mrb[7].mxu0 }
 0x2f6   :  { %696 = shalt.err (!%p693_p8)
}
 0x2f7   :  { %s697_s6 = scalar_lea.hbm %s879_s7, 128 }
 0x2f8   :  { %p698_p9 = scmp.ne.s32.totalorder %s879_s7, %s697_s6  ;;  %p701_p10 = scmp.lt.u32.totalorder %s697_s6, %s879_s7 }
 0x2fa   :  { %p703_p11 = pnand %p701_p10, %p698_p9 }
 0x2fc   :  { %706 = shalt.err (!%p703_p11)
}
 0x2fd   :  { %442 = dma.vmem_to_hbm [thread:$0]  %s440_s29, 128, %s879_s7, [#allocation5]  }
 0x2fe   :  { %713 = dma.done.wait [#allocation5], 128  }
 0x2ff   :  { %714 = vsyncadd [#allocation5], 4294967168 }
 0x300   :  { %446 = vsyncpa [#allocation4], 1 }
 0x301   :  { %447 = vsyncpa [#allocation7], 1 }
 0x302   :  { %448 = vsyncpa [#allocation10], 1 }
 0x303   :  { %449 = vsyncpa [#allocation5], 1 }

</bundles_post_ra>
